<compile_context>
chip_gen: v7x
topology: tpu7x:2x2x1
jax: 0.10.0
libtpu: 0.0.40
codegen_flags: <defaults>
</compile_context>

<pallas_src>
import jax
import jax.numpy as jnp
from jax.experimental import pallas as pl
from jax.experimental.pallas import tpu as pltpu


def _loss_body(loc_pre_ref, loc_tgt_ref, loc_mask_ref, vis_tgt_ref, vis_pre_ref,
               out_ref, *, num_keypoints, point1, point2, normalized,
               loc_vis_weight, vis_balance_weight, batch_size):
    K = num_keypoints
    B = batch_size

    loc_pre = loc_pre_ref[...].astype(jnp.float32)        # (B, 2K)
    loc_tgt = loc_tgt_ref[...].astype(jnp.float32)        # (B, 2K)
    loc_mask = loc_mask_ref[...]                          # (B, 2K), {0,1} f32

    # --- masked (optionally normalized) MSE, mean over all B*2K entries ---
    err = (loc_pre - loc_tgt) ** 2
    masked = err * loc_mask

    if normalized:
        # PairwiseDistance(p=2, eps=1e-6)(tgt[:, 2p1:2p1+2], tgt[:, 2p2:2p2+2]) ** 2
        eps = 1e-6
        a = loc_tgt[:, 2 * point1:2 * point1 + 2]         # (B, 2)
        b = loc_tgt[:, 2 * point2:2 * point2 + 2]         # (B, 2)
        d = a - b + eps
        nsv = jnp.sum(d * d, axis=1, keepdims=True)       # (B, 1)
        nsv = jnp.where(nsv < 0.001, jnp.float32(1.0), nsv)
        inv = 1.0 / nsv
        norm_vec = (jnp.float32(B) / jnp.sum(inv)) * inv  # (B, 1) ≡ norm_mask columns
        masked = masked * norm_vec

    loc_loss = jnp.sum(masked) * jnp.float32(1.0 / (B * 2 * K))
    total = jnp.float32(loc_vis_weight[0]) * loc_loss

    # --- weighted 3-class CrossEntropy over all K keypoints, fully vectorized ---
    if vis_pre_ref is not None:
        vis_tgt = vis_tgt_ref[...]                        # (B, K) int32
        vp = vis_pre_ref[...].astype(jnp.float32)         # (B, 3K), class-major layout
        l0 = vp[:, 0 * K:1 * K]                           # (B, K) class-0 logits
        l1 = vp[:, 1 * K:2 * K]                           # (B, K) class-1 logits
        l2 = vp[:, 2 * K:3 * K]                           # (B, K) class-2 logits
        m = jnp.maximum(jnp.maximum(l0, l1), l2)
        lse = m + jnp.log(jnp.exp(l0 - m) + jnp.exp(l1 - m) + jnp.exp(l2 - m))
        y0 = (vis_tgt == 0).astype(jnp.float32)
        y1 = (vis_tgt == 1).astype(jnp.float32)
        y2 = (vis_tgt == 2).astype(jnp.float32)
        w0, w1, w2 = (jnp.float32(w) for w in vis_balance_weight)
        wy = w0 * y0 + w1 * y1 + w2 * y2                  # (B, K) per-sample class weight
        pick = y0 * (l0 - lse) + y1 * (l1 - lse) + y2 * (l2 - lse)   # log p(y)
        # Per-keypoint weighted-mean reduction (PyTorch CrossEntropyLoss semantics),
        # then summed over keypoints: one sublane reduction per quantity + one lane sum.
        num = jnp.sum(wy * pick, axis=0, keepdims=True)   # (1, K)
        den = jnp.sum(wy, axis=0, keepdims=True)          # (1, K)
        vis_loss = -jnp.sum(num / den)
        total = total + jnp.float32(loc_vis_weight[1]) * vis_loss

    out_ref[0, 0] = total


def _make_kernel(has_vis_pre, **static):
    if has_vis_pre:
        def kernel(lp, lt, lm, vt, vp, out):
            _loss_body(lp, lt, lm, vt, vp, out, **static)
    else:
        def kernel(lp, lt, lm, out):
            _loss_body(lp, lt, lm, None, None, out, **static)
    return kernel


def norm_keypoint_loss(loc_pre, loc_target, vis_target, vis_pre=None, *,
                       num_keypoints, stan_point, normalized=False,
                       loc_vis_weight=(1.0, 1.0),
                       vis_balance_weight=(0.5, 0.45, 0.05)):
    B = int(loc_pre.shape[0])
    K = int(num_keypoints)
    point1, point2 = (int(p) for p in stan_point)
    has_vis = vis_pre is not None

    # Layout plumbing done in XLA (fuses into neighbouring ops; keeps the kernel a single
    # short full-width VPU/EUP pass with no MXU section and no per-keypoint loop):
    loc_mask = jnp.repeat((vis_target != 0).astype(jnp.float32), 2, axis=1)   # (B, 2K)
    inputs = [loc_pre.astype(jnp.float32), loc_target.astype(jnp.float32), loc_mask]
    if has_vis:
        # (B, 3K) keypoint-major -> class-major: three contiguous (B, K) lane slices.
        vis_pre_t = (vis_pre.astype(jnp.float32)
                     .reshape(B, K, 3).transpose(0, 2, 1).reshape(B, 3 * K))
        inputs += [vis_target.astype(jnp.int32), vis_pre_t]

    kernel = _make_kernel(
        has_vis,
        num_keypoints=K,
        point1=point1,
        point2=point2,
        normalized=bool(normalized),
        loc_vis_weight=tuple(float(w) for w in loc_vis_weight),
        vis_balance_weight=tuple(float(w) for w in vis_balance_weight),
        batch_size=B,
    )

    # Advisory cost hint so XLA schedules around this tiny launch sensibly.
    flops = 8 * B * 2 * K + (16 * B if normalized else 0)
    transcendentals = 0
    if has_vis:
        flops += 30 * B * K
        transcendentals = 4 * B * K
    bytes_accessed = int(sum(x.size * x.dtype.itemsize for x in inputs)) + 4

    out = pl.pallas_call(
        kernel,
        out_shape=jax.ShapeDtypeStruct((1, 1), jnp.float32),
        in_specs=[pl.BlockSpec(memory_space=pltpu.MemorySpace.VMEM)] * len(inputs),
        out_specs=pl.BlockSpec(memory_space=pltpu.MemorySpace.SMEM),
        cost_estimate=pl.CostEstimate(flops=flops,
                                      transcendentals=transcendentals,
                                      bytes_accessed=bytes_accessed),
    )(*inputs)
    return out[0, 0]


# ---- pure-JAX reference (for correctness check only) ----
def _reference(loc_pre, loc_target, vis_target, vis_pre, *, num_keypoints, stan_point,
               normalized, loc_vis_weight=(1.0, 1.0),
               vis_balance_weight=(0.5, 0.45, 0.05)):
    B = loc_pre.shape[0]
    K = num_keypoints
    p1, p2 = stan_point
    d = loc_target[:, 2 * p1:2 * p1 + 2] - loc_target[:, 2 * p2:2 * p2 + 2] + 1e-6
    nsv = jnp.sum(d * d, axis=1, keepdims=True)
    nsv = jnp.where(nsv < 0.001, 1.0, nsv)
    inv = 1.0 / nsv
    norm = (B / jnp.sum(inv)) * inv
    loc_mask = jnp.repeat((vis_target != 0).astype(jnp.float32), 2, axis=1)
    err = (loc_pre - loc_target) ** 2
    loc_loss = jnp.mean(err * loc_mask * norm) if normalized else jnp.mean(err * loc_mask)
    total = loc_vis_weight[0] * loc_loss
    if vis_pre is not None:
        w = jnp.asarray(vis_balance_weight, jnp.float32)
        vis_loss = jnp.float32(0.0)
        for i in range(K):
            logits = vis_pre[:, 3 * i:3 * i + 3]
            lsm = jax.nn.log_softmax(logits, axis=1)
            y = vis_target[:, i]
            wy = w[y]
            pick = jnp.take_along_axis(lsm, y[:, None], axis=1)[:, 0]
            vis_loss = vis_loss + (-jnp.sum(wy * pick) / jnp.sum(wy))
        total = total + loc_vis_weight[1] * vis_loss
    return total


if __name__ == "__main__":
    key = jax.random.PRNGKey(0)
    B, K = 8, 8
    k1, k2, k3, k4 = jax.random.split(key, 4)
    loc_pre = jax.random.normal(k1, (B, 2 * K), jnp.float32)
    loc_target = jax.random.normal(k2, (B, 2 * K), jnp.float32)
    vis_target = jax.random.randint(k3, (B, K), 0, 3, jnp.int32)
    vis_pre = jax.random.normal(k4, (B, 3 * K), jnp.float32)

    for normalized in (True, False):
        common = dict(num_keypoints=K, stan_point=(0, 1), normalized=normalized)

        # Full path (loc loss + weighted visibility cross-entropy).
        loss_full = jax.block_until_ready(
            norm_keypoint_loss(loc_pre, loc_target, vis_target, vis_pre, **common))
        ref_full = _reference(loc_pre, loc_target, vis_target, vis_pre, **common)
        assert jnp.allclose(loss_full, ref_full, rtol=1e-4, atol=1e-4), (
            normalized, loss_full, ref_full)

        # vis_pre=None branch (location loss only).
        loss_loc = jax.block_until_ready(
            norm_keypoint_loss(loc_pre, loc_target, vis_target, None, **common))
        ref_loc = _reference(loc_pre, loc_target, vis_target, None, **common)
        assert jnp.allclose(loss_loc, ref_loc, rtol=1e-4, atol=1e-4), (
            normalized, loss_loc, ref_loc)

    print("KERNEL_OK")
</pallas_src>

<mosaic_0001>
module attributes {stable_mosaic.version = 11 : i64} {
  func.func @kernel(%arg0: memref<8x16xf32, #tpu.memory_space<vmem>>, %arg1: memref<8x16xf32, #tpu.memory_space<vmem>>, %arg2: memref<8x16xf32, #tpu.memory_space<vmem>>, %arg3: memref<8x8xi32, #tpu.memory_space<vmem>>, %arg4: memref<8x24xf32, #tpu.memory_space<vmem>>, %arg5: memref<1x1xf32, #tpu.memory_space<smem>>) attributes {dimension_semantics = [], scalar_prefetch = 0 : i64, scratch_operands = 0 : i64, tpu.core_type = #tpu.core_type<tc>} {
    %c0 = arith.constant 0 : index
    %c0_0 = arith.constant 0 : index
    %0 = vector.load %arg0[%c0, %c0_0] : memref<8x16xf32, #tpu.memory_space<vmem>>, vector<8x16xf32>
    %c0_1 = arith.constant 0 : index
    %c0_2 = arith.constant 0 : index
    %1 = vector.load %arg1[%c0_1, %c0_2] : memref<8x16xf32, #tpu.memory_space<vmem>>, vector<8x16xf32>
    %c0_3 = arith.constant 0 : index
    %c0_4 = arith.constant 0 : index
    %2 = vector.load %arg2[%c0_3, %c0_4] : memref<8x16xf32, #tpu.memory_space<vmem>>, vector<8x16xf32>
    %3 = arith.subf %0, %1 : vector<8x16xf32>
    %4 = arith.mulf %3, %3 : vector<8x16xf32>
    %5 = arith.mulf %4, %2 : vector<8x16xf32>
    %6 = vector.extract_strided_slice %1 {offsets = [0, 0], sizes = [8, 2], strides = [1, 1]} : vector<8x16xf32> to vector<8x2xf32>
    %7 = vector.extract_strided_slice %1 {offsets = [0, 2], sizes = [8, 2], strides = [1, 1]} : vector<8x16xf32> to vector<8x2xf32>
    %8 = arith.subf %6, %7 : vector<8x2xf32>
    %cst = arith.constant 9.99999997E-7 : f32
    %9 = vector.broadcast %cst : f32 to vector<8x2xf32>
    %10 = arith.addf %8, %9 : vector<8x2xf32>
    %11 = arith.mulf %10, %10 : vector<8x2xf32>
    %cst_5 = arith.constant dense<0.000000e+00> : vector<8xf32>
    %12 = vector.multi_reduction <add>, %11, %cst_5 [1] : vector<8x2xf32> to vector<8xf32>
    %13 = vector.shape_cast %12 : vector<8xf32> to vector<8x1xf32>
    %cst_6 = arith.constant 1.000000e-03 : f32
    %14 = vector.broadcast %cst_6 : f32 to vector<8x1xf32>
    %15 = arith.cmpf olt, %13, %14 : vector<8x1xf32>
    %cst_7 = arith.constant 1.000000e+00 : f32
    %16 = vector.broadcast %cst_7 : f32 to vector<8x1xf32>
    %17 = arith.select %15, %16, %13 : vector<8x1xi1>, vector<8x1xf32>
    %cst_8 = arith.constant 1.000000e+00 : f32
    %18 = vector.broadcast %cst_8 : f32 to vector<8x1xf32>
    %19 = arith.divf %18, %17 : vector<8x1xf32>
    %20 = vector.shape_cast %19 : vector<8x1xf32> to vector<1x8x1xf32>
    %cst_9 = arith.constant dense<0.000000e+00> : vector<1xf32>
    %21 = vector.multi_reduction <add>, %20, %cst_9 [1, 2] : vector<1x8x1xf32> to vector<1xf32>
    %22 = vector.shape_cast %21 : vector<1xf32> to vector<1x1x1xf32>
    %23 = vector.extract %22[0, 0, 0] : f32 from vector<1x1x1xf32>
    %cst_10 = arith.constant 8.000000e+00 : f32
    %24 = arith.divf %cst_10, %23 : f32
    %25 = vector.broadcast %24 : f32 to vector<8x1xf32>
    %26 = arith.mulf %25, %19 : vector<8x1xf32>
    %27 = vector.broadcast %26 : vector<8x1xf32> to vector<8x16xf32>
    %28 = arith.mulf %5, %27 : vector<8x16xf32>
    %29 = vector.shape_cast %28 : vector<8x16xf32> to vector<1x8x16xf32>
    %cst_11 = arith.constant dense<0.000000e+00> : vector<1xf32>
    %30 = vector.multi_reduction <add>, %29, %cst_11 [1, 2] : vector<1x8x16xf32> to vector<1xf32>
    %31 = vector.shape_cast %30 : vector<1xf32> to vector<1x1x1xf32>
    %32 = vector.extract %31[0, 0, 0] : f32 from vector<1x1x1xf32>
    %cst_12 = arith.constant 7.812500e-03 : f32
    %33 = arith.mulf %32, %cst_12 : f32
    %cst_13 = arith.constant 1.000000e+00 : f32
    %34 = arith.mulf %cst_13, %33 : f32
    %c0_14 = arith.constant 0 : index
    %c0_15 = arith.constant 0 : index
    %35 = vector.load %arg3[%c0_14, %c0_15] : memref<8x8xi32, #tpu.memory_space<vmem>>, vector<8x8xi32>
    %c0_16 = arith.constant 0 : index
    %c0_17 = arith.constant 0 : index
    %36 = vector.load %arg4[%c0_16, %c0_17] : memref<8x24xf32, #tpu.memory_space<vmem>>, vector<8x24xf32>
    %37 = vector.extract_strided_slice %36 {offsets = [0, 0], sizes = [8, 8], strides = [1, 1]} : vector<8x24xf32> to vector<8x8xf32>
    %38 = vector.extract_strided_slice %36 {offsets = [0, 8], sizes = [8, 8], strides = [1, 1]} : vector<8x24xf32> to vector<8x8xf32>
    %39 = vector.extract_strided_slice %36 {offsets = [0, 16], sizes = [8, 8], strides = [1, 1]} : vector<8x24xf32> to vector<8x8xf32>
    %40 = arith.maximumf %37, %38 : vector<8x8xf32>
    %41 = arith.maximumf %40, %39 : vector<8x8xf32>
    %42 = arith.subf %37, %41 : vector<8x8xf32>
    %43 = math.exp %42 : vector<8x8xf32>
    %44 = arith.subf %38, %41 : vector<8x8xf32>
    %45 = math.exp %44 : vector<8x8xf32>
    %46 = arith.addf %43, %45 : vector<8x8xf32>
    %47 = arith.subf %39, %41 : vector<8x8xf32>
    %48 = math.exp %47 : vector<8x8xf32>
    %49 = arith.addf %46, %48 : vector<8x8xf32>
    %50 = math.log %49 : vector<8x8xf32>
    %51 = arith.addf %41, %50 : vector<8x8xf32>
    %c0_i32 = arith.constant 0 : i32
    %52 = vector.broadcast %c0_i32 : i32 to vector<8x8xi32>
    %53 = arith.cmpi eq, %35, %52 : vector<8x8xi32>
    %54 = arith.extui %53 : vector<8x8xi1> to vector<8x8xi32>
    %55 = arith.sitofp %54 : vector<8x8xi32> to vector<8x8xf32>
    %c1_i32 = arith.constant 1 : i32
    %56 = vector.broadcast %c1_i32 : i32 to vector<8x8xi32>
    %57 = arith.cmpi eq, %35, %56 : vector<8x8xi32>
    %58 = arith.extui %57 : vector<8x8xi1> to vector<8x8xi32>
    %59 = arith.sitofp %58 : vector<8x8xi32> to vector<8x8xf32>
    %c2_i32 = arith.constant 2 : i32
    %60 = vector.broadcast %c2_i32 : i32 to vector<8x8xi32>
    %61 = arith.cmpi eq, %35, %60 : vector<8x8xi32>
    %62 = arith.extui %61 : vector<8x8xi1> to vector<8x8xi32>
    %63 = arith.sitofp %62 : vector<8x8xi32> to vector<8x8xf32>
    %cst_18 = arith.constant 5.000000e-01 : f32
    %64 = vector.broadcast %cst_18 : f32 to vector<8x8xf32>
    %65 = arith.mulf %64, %55 : vector<8x8xf32>
    %cst_19 = arith.constant 4.500000e-01 : f32
    %66 = vector.broadcast %cst_19 : f32 to vector<8x8xf32>
    %67 = arith.mulf %66, %59 : vector<8x8xf32>
    %68 = arith.addf %65, %67 : vector<8x8xf32>
    %cst_20 = arith.constant 5.000000e-02 : f32
    %69 = vector.broadcast %cst_20 : f32 to vector<8x8xf32>
    %70 = arith.mulf %69, %63 : vector<8x8xf32>
    %71 = arith.addf %68, %70 : vector<8x8xf32>
    %72 = arith.subf %37, %51 : vector<8x8xf32>
    %73 = arith.mulf %55, %72 : vector<8x8xf32>
    %74 = arith.subf %38, %51 : vector<8x8xf32>
    %75 = arith.mulf %59, %74 : vector<8x8xf32>
    %76 = arith.addf %73, %75 : vector<8x8xf32>
    %77 = arith.subf %39, %51 : vector<8x8xf32>
    %78 = arith.mulf %63, %77 : vector<8x8xf32>
    %79 = arith.addf %76, %78 : vector<8x8xf32>
    %80 = arith.mulf %71, %79 : vector<8x8xf32>
    %cst_21 = arith.constant dense<0.000000e+00> : vector<8xf32>
    %81 = vector.multi_reduction <add>, %80, %cst_21 [0] : vector<8x8xf32> to vector<8xf32>
    %82 = vector.shape_cast %81 : vector<8xf32> to vector<1x8xf32>
    %cst_22 = arith.constant dense<0.000000e+00> : vector<8xf32>
    %83 = vector.multi_reduction <add>, %71, %cst_22 [0] : vector<8x8xf32> to vector<8xf32>
    %84 = vector.shape_cast %83 : vector<8xf32> to vector<1x8xf32>
    %85 = arith.divf %82, %84 : vector<1x8xf32>
    %86 = vector.shape_cast %85 : vector<1x8xf32> to vector<1x1x8xf32>
    %cst_23 = arith.constant dense<0.000000e+00> : vector<1xf32>
    %87 = vector.multi_reduction <add>, %86, %cst_23 [1, 2] : vector<1x1x8xf32> to vector<1xf32>
    %88 = vector.shape_cast %87 : vector<1xf32> to vector<1x1x1xf32>
    %89 = vector.extract %88[0, 0, 0] : f32 from vector<1x1x1xf32>
    %cst_24 = arith.constant 0.000000e+00 : f32
    %90 = arith.subf %cst_24, %89 : f32
    %cst_25 = arith.constant 1.000000e+00 : f32
    %91 = arith.mulf %cst_25, %90 : f32
    %92 = arith.addf %34, %91 : f32
    %c0_26 = arith.constant 0 : index
    %c0_27 = arith.constant 0 : index
    %93 = memref.load %arg5[%c0_26, %c0_27] : memref<1x1xf32, #tpu.memory_space<smem>>
    memref.store %92, %arg5[%c0_26, %c0_27] : memref<1x1xf32, #tpu.memory_space<smem>>
    return
  }
}

</mosaic_0001>

<bundles_post_ra>
// kernel: tpu_custom_call.1
= control target key start
LH: loop header
LB: loop body
LE: loop exit
PB: predicated region body
PF: predicated region fallthrough
CT: control target
= control target key end

     0   :  { %10 = vsyncpa [#allocation3], 0  ;;  %s519_s0 = inlined_call_operand.hbm [shape: f32[8,16], index: 0, kind: input, shape index: {}]   ;;  %s520_s1 = inlined_call_operand.hbm [shape: f32[8,16], index: 1, kind: input, shape index: {}]   ;;  %s521_s2 = inlined_call_operand.hbm [shape: f32[8,16], index: 2, kind: input, shape index: {}]   ;;  %s522_s3 = inlined_call_operand.vmem [shape: s32[8,8], index: 3, kind: input, shape index: {}]   ;;  %s523_s4 = inlined_call_operand.hbm [shape: f32[8,24], index: 4, kind: input, shape index: {}]   ;;  %s524_s5 = inlined_call_operand.hbm [shape: f32[1,1], index: 5, kind: output, shape index: {}]  }
   0x1   :  { %11 = vsyncpa [#allocation6], 0 }
   0x2   :  { %12 = vsyncpa [#allocation9], 0 }
   0x3   :  { %13 = vsyncpa [#allocation4], 0  ;;  %s387_s18 = smov [#allocation5]   ;;  %s388_s20 = smov [#allocation2]  }
   0x4   :  { %s30_s19 = sshll.u32 %s387_s18, 4  ;;  %s20_s21 = sshll.u32 %s388_s20, 4  ;;  %s31_s19 = int_to_ptr.vmem [resolvable:$true] %s30_s19  ;;  %s21_s21 = int_to_ptr.vmem [resolvable:$true] %s20_s21 }
   0x5   :  { %s281_s24 = scalar_lea.hbm %s520_s1, 128 }
   0x6   :  { %p282_p0 = scmp.ne.s32.totalorder %s520_s1, %s281_s24  ;;  %p285_p1 = scmp.lt.u32.totalorder %s281_s24, %s520_s1 }
   0x8   :  { %p287_p2 = pnand %p285_p1, %p282_p0 }
   0xa   :  { %290 = shalt.err (!%p287_p2)
}
   0xb   :  { %s291_s29 = scalar_lea.vmem %s31_s19, 128  ;;  %p296_p4 = scmp.lt.s32.totalorder %s31_s19, %s31_s19 }
   0xc   :  { %p292_p3 = scmp.ne.s32.totalorder %s31_s19, %s291_s29  ;;  %p297_p5 = scmp.lt.s32.totalorder %s291_s29, %s291_s29 }
   0xe   :  { %p298_p6 = por %p297_p5, %p296_p4 }
  0x10   :  { %p299_p7 = pnand %p298_p6, %p292_p3 }
  0x12   :  { %302 = shalt.err (!%p299_p7)
}
  0x13   :  { %33 = dma.hbm_to_vmem [thread:$0]  %s520_s1, 128, %s31_s19, [#allocation6]  }
  0x14   :  { %s303_s9 = scalar_lea.hbm %s519_s0, 128 }
  0x15   :  { %p304_p8 = scmp.ne.s32.totalorder %s519_s0, %s303_s9  ;;  %p307_p9 = scmp.lt.u32.totalorder %s303_s9, %s519_s0 }
  0x17   :  { %p309_p10 = pnand %p307_p9, %p304_p8 }
  0x19   :  { %312 = shalt.err (!%p309_p10)
}
  0x1a   :  { %s313_s14 = scalar_lea.vmem %s21_s21, 128  ;;  %p318_p12 = scmp.lt.s32.totalorder %s21_s21, %s21_s21 }
  0x1b   :  { %p314_p11 = scmp.ne.s32.totalorder %s21_s21, %s313_s14  ;;  %p319_p13 = scmp.lt.s32.totalorder %s313_s14, %s313_s14 }
  0x1d   :  { %p320_p0 = por %p319_p13, %p318_p12 }
  0x1f   :  { %p321_p1 = pnand %p320_p0, %p314_p11 }
  0x21   :  { %324 = shalt.err (!%p321_p1)
}
  0x22   :  { %23 = dma.hbm_to_vmem [thread:$0]  %s519_s0, 128, %s21_s21, [#allocation3]  }
  0x23   :  { %s389_s16 = smov [#allocation7]   ;;  %s390_s18 = smov [#allocation8]  }
  0x24   :  { %s40_s17 = sshll.u32 %s389_s16, 4  ;;  %s52_s19 = sshll.u32 %s390_s18, 4  ;;  %s41_s17 = int_to_ptr.vmem [resolvable:$true] %s40_s17  ;;  %s53_s19 = int_to_ptr.vmem [resolvable:$true] %s52_s19 }
  0x25   :  { %s325_s23 = scalar_lea.hbm %s521_s2, 128 }
  0x26   :  { %p326_p2 = scmp.ne.s32.totalorder %s521_s2, %s325_s23  ;;  %p329_p3 = scmp.lt.u32.totalorder %s325_s23, %s521_s2 }
  0x28   :  { %p331_p4 = pnand %p329_p3, %p326_p2 }
  0x2a   :  { %334 = shalt.err (!%p331_p4)
}
  0x2b   :  { %s335_s0 = scalar_lea.vmem %s41_s17, 128  ;;  %p340_p6 = scmp.lt.s32.totalorder %s41_s17, %s41_s17 }
  0x2c   :  { %p336_p5 = scmp.ne.s32.totalorder %s41_s17, %s335_s0  ;;  %p341_p7 = scmp.lt.s32.totalorder %s335_s0, %s335_s0 }
  0x2e   :  { %p342_p8 = por %p341_p7, %p340_p6 }
  0x30   :  { %p343_p9 = pnand %p342_p8, %p336_p5 }
  0x32   :  { %346 = shalt.err (!%p343_p9)
}
  0x33   :  { %43 = dma.hbm_to_vmem [thread:$0]  %s521_s2, 128, %s41_s17, [#allocation6]  }
  0x34   :  { %s347_s6 = scalar_lea.hbm %s523_s4, 128 }
  0x35   :  { %p348_p10 = scmp.ne.s32.totalorder %s523_s4, %s347_s6  ;;  %p351_p11 = scmp.lt.u32.totalorder %s347_s6, %s523_s4 }
  0x37   :  { %p353_p12 = pnand %p351_p11, %p348_p10 }
  0x39   :  { %356 = shalt.err (!%p353_p12)
}
  0x3a   :  { %s357_s11 = scalar_lea.vmem %s53_s19, 128  ;;  %p362_p0 = scmp.lt.s32.totalorder %s53_s19, %s53_s19 }
  0x3b   :  { %p358_p13 = scmp.ne.s32.totalorder %s53_s19, %s357_s11  ;;  %p363_p1 = scmp.lt.s32.totalorder %s357_s11, %s357_s11 }
  0x3d   :  { %p364_p2 = por %p363_p1, %p362_p0 }
  0x3f   :  { %p365_p3 = pnand %p364_p2, %p358_p13 }
  0x41   :  { %368 = shalt.err (!%p365_p3)
}
  0x42   :  { %55 = dma.hbm_to_vmem [thread:$0]  %s523_s4, 128, %s53_s19, [#allocation9]  }
  0x43   :  { %379 = dma.done.wait [#allocation3], 128  }
  0x44   :  { %380 = vsyncadd [#allocation3], 4294967168 }
  0x45   :  { %381 = dma.done.wait [#allocation6], 256  }
  0x46   :  { %382 = vsyncadd [#allocation6], 4294967040 }
  0x47   :  { %383 = dma.done.wait [#allocation9], 128  }
  0x48   :  { %384 = vsyncadd [#allocation9], 4294967168  ;;  %v476_v0 = vld [vmem:[#allocation5] sm:$0xff]  ;;  %v478_v1 = vld [vmem:[#allocation8] sm:$0xff]  ;;  %s391_s13 = smov 126   ;;  %s392_s14 = smov 112  }
  0x49   :  { %75 = vrot.lane.b32.xlu0 %v476_v0, %s391_s13  ;;  %126 = vrot.lane.b32.xlu1 %v478_v1, %s392_s14  ;;  %s393_s1 = smov 120   ;;  %vm81_vm0 = vcmask 15360   ;;  %s394_s4 = smov 8   ;;  %vm89_vm2 = vcmask 7168   ;;  %v68_v46 = vld [vmem:[#allocation2] sm:$0xff]  ;;  %v70_v49 = vld [vmem:[#allocation7] sm:$0xff] }
  0x4a   :  { %s395_s15 = smov 16   ;;  %v71_v47 = vsub.f32 %v68_v46, %v476_v0  ;;  %vm107_vm3 = vcmask 130048   ;;  %v119_v55 = vld [vmem:[%s522_s3] sm:$0xff]  ;;  %v396_v56 = vmov 0.0   ;;  %vm197_vm7 = vcmask 64512   ;;  %s369_s0 = scalar_lea.hbm %s524_s5, 16 }
  0x4b   :  { %vm162_vm4 = vcmp.eq.s32.totalorder %v119_v55, 1  ;;  %vm159_vm5 = vcmp.eq.s32.totalorder %v119_v55, 0  ;;  %vm165_vm6 = vcmp.eq.s32.totalorder %v119_v55, 2  ;;  %vm214_vm8 = vcmask 57344   ;;  %p370_p4 = scmp.ne.s32.totalorder %s524_s5, %s369_s0  ;;  %p373_p5 = scmp.lt.u32.totalorder %s369_s0, %s524_s5 }
  0x4c   :  { %v72_v48 = vmul.f32 %v71_v47, %v71_v47  ;;  %v246_v57 = vsel %vm162_vm4, 1.0, %v396_v56  ;;  %v245_v58 = vsel %vm159_vm5, 1.0, %v396_v56  ;;  %v247_v61 = vsel %vm165_vm6, 1.0, %v396_v56 }
  0x4d   :  { %122 = vrot.lane.b32.xlu0 %v478_v1, %s393_s1  ;;  %v168_v59 = vmul.f32 0.5, %v245_v58  ;;  %v169_v60 = vmul.f32 0.45, %v246_v57  ;;  %v171_v63 = vmul.f32 0.05, %v247_v61  ;;  %p375_p6 = pnand %p373_p5, %p370_p4 }
  0x4e   :  { %v73_v50 = vmul.f32 %v72_v48, %v70_v49 }
  0x4f   :  { %v170_v62 = vadd.f32 %v169_v60, %v168_v59 }
  0xbb   :  { %v76_v2 = vpop.permute.xlu0 %75  ;;  %v127_v6 = vpop.permute.xlu1 %126 }
  0xbc   :  { %v78_v3 = vsub.f32 %v476_v0, %v76_v2  ;;  %v172_v0 = vadd.f32 %v171_v63, %v170_v62 }
  0xbe   :  { %v79_v4 = vadd.f32 1e-06, %v78_v3  ;;  %v205_v2 = vsel %vm197_vm7, %v172_v0, 0.0 }
  0xbf   :  { %v123_v5 = vpop.permute.xlu0 %122  ;;  %v206_v3 = vrot.slane %v205_v2, 4 }
  0xc0   :  { %v80_v7 = vmul.f32 %v79_v4, %v79_v4  ;;  %v125_v8 = vmax.f32 %v478_v1, %v123_v5 }
  0xc1   :  { %v207_v4 = vadd.f32 %v206_v3, %v205_v2 }
  0xc2   :  { %v129_v9 = vmax.f32 %v125_v8, %v127_v6  ;;  %v82_v10 = vsel %vm81_vm0, %v80_v7, 0.0 }
  0xc3   :  { %83 = vadd.xlane.f32.xlu0 %v82_v10  ;;  %v208_v5 = vrot.slane %v207_v4, 2 }
  0xc4   :  { %134 = vrot.lane.b32.xlu1 %v129_v9, %s394_s4  ;;  %v130_v23 = vsub.f32 %v478_v1, %v129_v9 }
  0xc5   :  { %v209_v7 = vadd.f32 %v208_v5, %v207_v4 }
  0xc6   :  { %v131_v24 = vmul.f32 1.442695, %v130_v23 }
  0xc8   :  { %145 = vrot.lane.b32.xlu1 %v129_v9, %s395_s15 }
 0x136   :  { %v135_v11 = vpop.permute.xlu1 %134 }
 0x137   :  { %v137_v12 = vsub.f32 %v478_v1, %v135_v11  ;;  %v210_v11 = vrot.slane %v209_v7, 1 }
 0x139   :  { %v138_v13 = vmul.f32 1.442695, %v137_v12 }
 0x13a   :  { %v146_v14 = vpop.permute.xlu1 %145 }
 0x13b   :  { %267 = vpow2.f32 %v138_v13  ;;  %v148_v15 = vsub.f32 %v478_v1, %v146_v14 }
 0x13d   :  { %v149_v16 = vmul.f32 1.442695, %v148_v15  ;;  %v211_v15 = vadd.f32 %v210_v11, %v209_v7 }
 0x13f   :  { %269 = vpow2.f32 %v149_v16 }
 0x145   :  { %v268_v17 = vpop.eup %267 }
 0x146   :  { %141 = vrot.lane.b32.xlu1 %v268_v17, %s393_s1 }
 0x149   :  { %v270_v18 = vpop.eup %269 }
 0x14a   :  { %152 = vrot.lane.b32.xlu1 %v270_v18, %s392_s14 }
 0x150   :  { %v84_v19 = vpop.xlane.xlu0 %83 }
 0x151   :  { %vm85_vm1 = vcmp.lt.f32.partialorder %v84_v19, 0.001 }
 0x152   :  { %v86_v20 = vsel %vm85_vm1, 1.0, %v84_v19 }
 0x153   :  { %271 = vrcp.f32 %v86_v20 }
 0x154   :  { %273 = vpow2.f32 %v131_v24 }
 0x15d   :  { %v272_v21 = vpop.eup %271 }
 0x15e   :  { %v90_v22 = vsel %vm89_vm2, %v272_v21, 0.0  ;;  %v274_v26 = vpop.eup %273 }
 0x16e   :  { %91 = vadd.xlane.f32.xlu1 %v90_v22 }
 0x1b8   :  { %v142_v25 = vpop.permute.xlu1 %141 }
 0x1b9   :  { %v144_v27 = vadd.f32 %v274_v26, %v142_v25 }
 0x1bc   :  { %v153_v28 = vpop.permute.xlu1 %152 }
 0x1bd   :  { %v155_v29 = vadd.f32 %v153_v28, %v144_v27 }
 0x1bf   :  { %275 = vlog2.f32 %v155_v29 }
 0x1c9   :  { %v276_v30 = vpop.eup %275 }
 0x1ca   :  { %v157_v31 = vmul.f32 0.6931472, %v276_v30 }
 0x1cc   :  { %v158_v32 = vadd.f32 %v157_v31, %v129_v9 }
 0x1ce   :  { %176 = vrot.lane.b32.xlu0 %v158_v32, %s394_s4  ;;  %186 = vrot.lane.b32.xlu1 %v158_v32, %s395_s15  ;;  %v173_v6 = vsub.f32 %v478_v1, %v158_v32 }
 0x1d0   :  { %v174_v10 = vmul.f32 %v245_v58, %v173_v6 }
 0x1fb   :  { %v92_v33 = vpop.xlane.xlu1 %91 }
 0x1fc   :  { %v93_v34 = vrot.slane %v92_v33, 4 }
 0x1fe   :  { %v94_v35 = vadd.f32 %v93_v34, %v92_v33 }
 0x200   :  { %v95_v36 = vrot.slane %v94_v35, 2 }
 0x202   :  { %v96_v37 = vadd.f32 %v95_v36, %v94_v35 }
 0x204   :  { %v97_v38 = vrot.slane %v96_v37, 1 }
 0x206   :  { %v98_v39 = vadd.f32 %v97_v38, %v96_v37 }
 0x208   :  { %248 = vpush %v98_v39 }
 0x239   :  { %s249_s16 = spop %248 }
 0x23a   :  { %v100_v40 = vstv %s249_s16 }
 0x23b   :  { %277 = vrcp.f32 %v100_v40 }
 0x23c   :  { %279 = vrcp.f32 %v211_v15 }
 0x240   :  { %v177_v41 = vpop.permute.xlu0 %176  ;;  %v187_v43 = vpop.permute.xlu1 %186 }
 0x241   :  { %v179_v42 = vsub.f32 %v478_v1, %v177_v41  ;;  %v189_v45 = vsub.f32 %v478_v1, %v187_v43 }
 0x243   :  { %181 = vrot.lane.b32.xlu0 %v179_v42, %s393_s1 }
 0x245   :  { %v278_v44 = vpop.eup %277 }
 0x246   :  { %250 = vpush %v278_v44  ;;  %v280_v1 = vpop.eup %279 }
 0x247   :  { %191 = vrot.lane.b32.xlu0 %v189_v45, %s392_s14 }
 0x277   :  { %s251_s17 = spop %250 }
 0x278   :  { %s103_s18 = smul.f32 8.0, %s251_s17 }
 0x27a   :  { %v104_v51 = vstv %s103_s18 }
 0x27b   :  { %v105_v52 = vmul.f32 %v272_v21, %v104_v51 }
 0x27d   :  { %v106_v53 = vmul.f32 %v105_v52, %v73_v50 }
 0x27f   :  { %v108_v54 = vsel %vm107_vm3, %v106_v53, 0.0 }
 0x280   :  { %109 = vadd.xlane.f32.xlu0 %v108_v54 }
 0x2b5   :  { %v182_v8 = vpop.permute.xlu0 %181 }
 0x2b6   :  { %v184_v9 = vmul.f32 %v246_v57, %v182_v8 }
 0x2b8   :  { %v185_v13 = vadd.f32 %v184_v9, %v174_v10 }
 0x2b9   :  { %v192_v12 = vpop.permute.xlu0 %191 }
 0x2ba   :  { %v194_v14 = vmul.f32 %v247_v61, %v192_v12 }
 0x2bc   :  { %v195_v16 = vadd.f32 %v194_v14, %v185_v13 }
 0x2be   :  { %v196_v17 = vmul.f32 %v195_v16, %v172_v0 }
 0x2c0   :  { %v198_v18 = vsel %vm197_vm7, %v196_v17, 0.0 }
 0x2c1   :  { %v199_v19 = vrot.slane %v198_v18, 4 }
 0x2c3   :  { %v200_v20 = vadd.f32 %v199_v19, %v198_v18 }
 0x2c5   :  { %v201_v21 = vrot.slane %v200_v20, 2 }
 0x2c7   :  { %v202_v22 = vadd.f32 %v201_v21, %v200_v20 }
 0x2c9   :  { %v203_v23 = vrot.slane %v202_v22, 1 }
 0x2cb   :  { %v204_v24 = vadd.f32 %v203_v23, %v202_v22 }
 0x2cd   :  { %v213_v25 = vmul.f32 %v280_v1, %v204_v24 }
 0x2cf   :  { %v215_v26 = vsel %vm214_vm8, %v213_v25, 0.0 }
 0x2d0   :  { %216 = vadd.xlane.f32.xlu1 %v215_v26 }
 0x30d   :  { %v110_v27 = vpop.xlane.xlu0 %109 }
 0x30e   :  { %v111_v28 = vrot.slane %v110_v27, 4 }
 0x310   :  { %v112_v29 = vadd.f32 %v111_v28, %v110_v27 }
 0x312   :  { %v113_v30 = vrot.slane %v112_v29, 2 }
 0x314   :  { %v114_v31 = vadd.f32 %v113_v30, %v112_v29 }
 0x316   :  { %v115_v32 = vrot.slane %v114_v31, 1 }
 0x318   :  { %v116_v33 = vadd.f32 %v115_v32, %v114_v31 }
 0x31a   :  { %252 = vpush %v116_v33 }
 0x34b   :  { %s253_s3 = spop %252 }
 0x34c   :  { %s118_s23 = smul.f32 0.0078125, %s253_s3 }
 0x35d   :  { %v217_v34 = vpop.xlane.xlu1 %216 }
 0x35e   :  { %v218_v35 = vrot.slane %v217_v34, 4 }
 0x360   :  { %v219_v36 = vadd.f32 %v218_v35, %v217_v34 }
 0x362   :  { %v220_v37 = vrot.slane %v219_v36, 2 }
 0x364   :  { %v221_v38 = vadd.f32 %v220_v37, %v219_v36 }
 0x366   :  { %v222_v39 = vrot.slane %v221_v38, 1 }
 0x368   :  { %v223_v40 = vadd.f32 %v222_v39, %v221_v38 }
 0x36a   :  { %254 = vpush %v223_v40 }
 0x39b   :  { %s255_s22 = spop %254 }
 0x39c   :  { %s225_s24 = ssub.f32 0.0, %s255_s22 }
 0x39e   :  { %s226_s25 = sadd.f32 %s225_s24, %s118_s23 }
 0x3a0   :  { %228 = sst [smem:[#allocation10]] %s226_s25 }
 0x3a1   :  { %378 = shalt.err (!%p375_p6)
}
 0x3a2   :  { %s397_s6 = smov [#allocation10]  }
 0x3a3   :  { %236 = dma.smem_to_hbm %s397_s6, 16, %s524_s5, [#allocation4]  }
 0x3a4   :  { %385 = dma.done.wait [#allocation4], 16  }
 0x3a5   :  { %386 = vsyncadd [#allocation4], 4294967280 }
 0x3a6   :  { %240 = sfence }
 0x3a7   :  { %241 = vsyncpa [#allocation3], 1 }
 0x3a8   :  { %242 = vsyncpa [#allocation6], 1 }
 0x3a9   :  { %243 = vsyncpa [#allocation9], 1 }
 0x3aa   :  { %244 = vsyncpa [#allocation4], 1 }

</bundles_post_ra>
